<compile_context>
chip_gen: v7x
topology: tpu7x:2x2x1
jax: 0.10.0
libtpu: 0.0.40
codegen_flags: <defaults>
</compile_context>

<pallas_src>
import functools

import jax
import jax.numpy as jnp
from jax.experimental import pallas as pl
from jax.experimental.pallas import tpu as pltpu


# ---------------------------------------------------------------------------
# Small helpers
# ---------------------------------------------------------------------------
def _round_up(v: int, m: int) -> int:
    return ((v + m - 1) // m) * m


def _batch_tile(batch: int, row_bytes: int, target_bytes: int) -> int:
    """Pick the batch (sublane) tile TB.

    * If the whole (padded) tensor fits within `target_bytes`, use a single
      block (grid=(1,)) -- no per-step overhead, which dominates for the tiny
      tensors rSoftMax sees.
    * Otherwise TB is the largest multiple of 8 rows that fits, and the grid
      uses pl.cdiv with a ragged last block (TB need not divide batch).
    `target_bytes` (default 4 MiB/buffer) keeps 2 operands x 2 pipeline
    buffers well under the 32 MiB scoped-VMEM default (64 MiB physical v7x).
    """
    if _round_up(batch, 8) * row_bytes <= target_bytes:
        return batch
    tb = max(8, ((target_bytes // max(1, row_bytes)) // 8) * 8)
    return min(tb, batch)


# ---------------------------------------------------------------------------
# Pallas kernels
# ---------------------------------------------------------------------------
def _rsoftmax_kernel(x_ref, o_ref, *, radix, m):
    """Softmax over `radix` static lane-slices of a (TB, radix*m) block.

    Batch rows are on sublanes; each radix slice is a dense (TB, m) lane
    slab, so the cross-radix max/sum are plain VPU elementwise ops.
    """
    if radix == 2:
        # softmax([x0, x1]) == [sigmoid(x0 - x1), 1 - sigmoid(x0 - x1)]
        x0 = x_ref[:, 0:m].astype(jnp.float32)
        x1 = x_ref[:, m:2 * m].astype(jnp.float32)
        p0 = pl.reciprocal(1.0 + jnp.exp(x1 - x0), approx=True)   # EUP
        p1 = 1.0 - p0                                             # rows sum to 1
        o_ref[:, 0:m] = p0.astype(o_ref.dtype)
        o_ref[:, m:2 * m] = p1.astype(o_ref.dtype)
        return

    # General radix: unrolled max / exp / sum across the radix lane-slices.
    xs = [x_ref[:, r * m:(r + 1) * m].astype(jnp.float32) for r in range(radix)]
    mx = xs[0]
    for v in xs[1:]:
        mx = jnp.maximum(mx, v)
    es = [jnp.exp(v - mx) for v in xs]
    s = es[0]
    for e in es[1:]:
        s = s + e
    inv = pl.reciprocal(s, approx=True)                           # EUP, ~free
    for r in range(radix):
        o_ref[:, r * m:(r + 1) * m] = (es[r] * inv).astype(o_ref.dtype)


def _sigmoid_kernel(x_ref, o_ref):
    """Elementwise sigmoid on a (TB, N) block (radix == 1 branch)."""
    x = x_ref[...].astype(jnp.float32)
    o_ref[...] = pl.reciprocal(1.0 + jnp.exp(-x), approx=True).astype(o_ref.dtype)


# ---------------------------------------------------------------------------
# Wrapper mirroring rSoftMax.forward
# ---------------------------------------------------------------------------
def rsoftmax(x, radix: int, cardinality: int, *, target_block_bytes: int = 4 << 20):
    """x: (B, C, H, W). Returns (B, C*H*W) if radix > 1 else x-shaped sigmoid."""
    batch = x.shape[0]
    itemsize = jnp.dtype(x.dtype).itemsize

    if radix > 1:
        rest = x.size // (batch * cardinality * radix)
        m = cardinality * rest          # elements per radix slice, per row
        n = radix * m                   # full per-row payload (= C*H*W)

        # ---- layout glue (wrapper side) -----------------------------------
        # Target per-row order is (radix, cardinality, rest) -- exactly what
        # PyTorch's transpose(1, 2) + reshape(B, -1) produces.
        if cardinality == 1:
            # x is already (radix, rest)-ordered per row: pure reshape, no copy.
            xr = x.reshape(batch, n)
        else:
            # One XLA transpose copy for the (card, radix) permute.  Folding it
            # into BlockSpecs only pays when `rest` is a multiple of 128
            # (lane-dense strided DMA); for generality keep it wrapper-side.
            xr = x.reshape(batch, cardinality, radix, rest)
            xr = jnp.transpose(xr, (0, 2, 1, 3)).reshape(batch, n)

        row_bytes = _round_up(n, 128) * itemsize
        tb = _batch_tile(batch, row_bytes, target_block_bytes)

        out = pl.pallas_call(
            functools.partial(_rsoftmax_kernel, radix=radix, m=m),
            out_shape=jax.ShapeDtypeStruct((batch, n), x.dtype),
            grid=(pl.cdiv(batch, tb),),
            in_specs=[pl.BlockSpec((tb, n), lambda b: (b, 0))],
            out_specs=pl.BlockSpec((tb, n), lambda b: (b, 0)),
            compiler_params=pltpu.CompilerParams(
                dimension_semantics=("parallel",)),
        )(xr)
        # Output already has the final (radix, card, rest) per-row order, so
        # this matches torch's reshape(batch, -1) with no further copies.
        return out

    # radix == 1: elementwise sigmoid, shape preserved.
    # (In production this is best left to XLA fusion with its producer; kept
    #  here as a properly tiled Pallas kernel so the module is self-contained.)
    n = x.size // batch
    x2 = x.reshape(batch, n)
    row_bytes = _round_up(n, 128) * itemsize
    tb = _batch_tile(batch, row_bytes, target_block_bytes)
    out = pl.pallas_call(
        _sigmoid_kernel,
        out_shape=jax.ShapeDtypeStruct((batch, n), x.dtype),
        grid=(pl.cdiv(batch, tb),),
        in_specs=[pl.BlockSpec((tb, n), lambda b: (b, 0))],
        out_specs=pl.BlockSpec((tb, n), lambda b: (b, 0)),
        compiler_params=pltpu.CompilerParams(
            dimension_semantics=("parallel",)),
    )(x2)
    return out.reshape(x.shape)


# ---------------------------------------------------------------------------
# Pure-JAX reference (mirrors the PyTorch code exactly)
# ---------------------------------------------------------------------------
def rsoftmax_ref(x, radix, cardinality):
    batch = x.shape[0]
    if radix > 1:
        rest = x.size // (batch * cardinality * radix)
        xr = x.reshape(batch, cardinality, radix, rest)
        xr = jnp.transpose(xr, (0, 2, 1, 3))
        xr = jax.nn.softmax(xr, axis=1)
        return xr.reshape(batch, -1)
    return jax.nn.sigmoid(x)


if __name__ == "__main__":
    key = jax.random.PRNGKey(0)
    k1, k2, k3, k4, k5 = jax.random.split(key, 5)

    # pl.reciprocal(approx=True) is an EUP approximation; errors on [0,1]
    # probabilities stay well under 5e-3 (and radix==2 rows sum to exactly 1).
    TOL = 5e-3

    # (a) ResNeSt-style config: radix=2, cardinality=1 -> no wrapper copies,
    #     single block, batch on sublanes, radix as lane slices.
    B, radix, card, rc = 8, 2, 1, 128
    C = radix * card * rc
    xa = jax.random.normal(k1, (B, C, 1, 1), dtype=jnp.float32)
    outa = jax.block_until_ready(rsoftmax(xa, radix, card))
    refa = rsoftmax_ref(xa, radix, card)
    assert outa.shape == (B, C)
    assert jnp.allclose(outa, refa, atol=TOL, rtol=TOL), "radix>1 card=1 mismatch"

    # (b) cardinality > 1 path: radix=2, card=2, rc=8 (one wrapper transpose).
    B2, radix2, card2, rc2 = 2, 2, 2, 8
    C2 = radix2 * card2 * rc2
    xb = jax.random.normal(k2, (B2, C2, 1, 1), dtype=jnp.float32)
    outb = jax.block_until_ready(rsoftmax(xb, radix2, card2))
    refb = rsoftmax_ref(xb, radix2, card2)
    assert outb.shape == (B2, C2)
    assert jnp.allclose(outb, refb, atol=TOL, rtol=TOL), "radix>1 card>1 mismatch"

    # (c) radix == 1 (sigmoid) branch.
    xc = jax.random.normal(k3, (16, 16, 1, 1), dtype=jnp.float32)
    outc = jax.block_until_ready(rsoftmax(xc, radix=1, cardinality=1))
    refc = rsoftmax_ref(xc, 1, 1)
    assert outc.shape == xc.shape
    assert jnp.allclose(outc, refc, atol=TOL, rtol=TOL), "sigmoid mismatch"

    # (d) bf16 input: bf16 loads/stores, f32 compute.
    xd = jax.random.normal(k4, (B, C, 1, 1), dtype=jnp.float32).astype(jnp.bfloat16)
    outd = jax.block_until_ready(rsoftmax(xd, radix, card))
    refd = rsoftmax_ref(xd.astype(jnp.float32), radix, card)
    assert jnp.allclose(outd.astype(jnp.float32), refd, atol=2e-2, rtol=2e-2), \
        "bf16 mismatch"

    # (e) radix=4 general path + forced multi-block tiling (even division):
    #     B=32, n=4*256=1024 -> row_bytes=4096; 16 KiB budget -> TB=8, grid=4.
    B3, radix3, card3, rc3 = 32, 4, 1, 256
    C3 = radix3 * card3 * rc3
    xe = jax.random.normal(k5, (B3, C3, 1, 1), dtype=jnp.float32)
    oute = jax.block_until_ready(
        rsoftmax(xe, radix3, card3, target_block_bytes=16 * 1024))
    refe = rsoftmax_ref(xe, radix3, card3)
    assert oute.shape == (B3, C3)
    assert jnp.allclose(oute, refe, atol=TOL, rtol=TOL), "radix=4 tiled mismatch"

    # (f) ragged last block: B=20, TB=8 -> grid=cdiv(20,8)=3 (partial tail).
    xf = jax.random.normal(k1, (20, C3, 1, 1), dtype=jnp.float32)
    outf = jax.block_until_ready(
        rsoftmax(xf, radix3, card3, target_block_bytes=16 * 1024))
    reff = rsoftmax_ref(xf, radix3, card3)
    assert jnp.allclose(outf, reff, atol=TOL, rtol=TOL), "ragged-batch mismatch"

    print("KERNEL_OK")
</pallas_src>

<mosaic_0001>
module attributes {stable_mosaic.version = 11 : i64} {
  func.func @_rsoftmax_kernel(%arg0: i32, %arg1: memref<8x256xf32, #tpu.memory_space<vmem>>, %arg2: memref<8x256xf32, #tpu.memory_space<vmem>>) attributes {dimension_semantics = [#tpu.dimension_semantics<parallel>], iteration_bounds = array<i64: 1>, scalar_prefetch = 0 : i64, scratch_operands = 0 : i64, tpu.core_type = #tpu.core_type<tc>, window_params = [{transform_indices = @transform_0, window_bounds = array<i64: 8, 256>}, {transform_indices = @transform_1, window_bounds = array<i64: 8, 256>}]} {
    %c0 = arith.constant 0 : index
    %c0_0 = arith.constant 0 : index
    %0 = vector.load %arg1[%c0, %c0_0] : memref<8x256xf32, #tpu.memory_space<vmem>>, vector<8x128xf32>
    %c0_1 = arith.constant 0 : index
    %c128 = arith.constant 128 : index
    %1 = vector.load %arg1[%c0_1, %c128] : memref<8x256xf32, #tpu.memory_space<vmem>>, vector<8x128xf32>
    %2 = arith.subf %1, %0 : vector<8x128xf32>
    %3 = math.exp %2 : vector<8x128xf32>
    %cst = arith.constant 1.000000e+00 : f32
    %4 = vector.broadcast %cst : f32 to vector<8x128xf32>
    %5 = arith.addf %4, %3 : vector<8x128xf32>
    %6 = tpu.reciprocal %5 {approx = true} : vector<8x128xf32> -> vector<8x128xf32>
    %cst_2 = arith.constant 1.000000e+00 : f32
    %7 = vector.broadcast %cst_2 : f32 to vector<8x128xf32>
    %8 = arith.subf %7, %6 : vector<8x128xf32>
    %c0_3 = arith.constant 0 : index
    %c0_4 = arith.constant 0 : index
    %9 = vector.load %arg2[%c0_3, %c0_4] : memref<8x256xf32, #tpu.memory_space<vmem>>, vector<8x128xf32>
    tpu.vector_store %arg2[%c0_3, %c0_4], %6 {strides = array<i32>} : memref<8x256xf32, #tpu.memory_space<vmem>>, vector<8x128xf32>,
    %c0_5 = arith.constant 0 : index
    %c128_6 = arith.constant 128 : index
    %10 = vector.load %arg2[%c0_5, %c128_6] : memref<8x256xf32, #tpu.memory_space<vmem>>, vector<8x128xf32>
    tpu.vector_store %arg2[%c0_5, %c128_6], %8 {strides = array<i32>} : memref<8x256xf32, #tpu.memory_space<vmem>>, vector<8x128xf32>,
    return
  }
  func.func @transform_0(%arg0: i32) -> (i32, i32) {
    %c0_i32 = arith.constant 0 : i32
    %c0_i32_0 = arith.constant 0 : i32
    return %arg0, %c0_i32 : i32, i32
  }
  func.func @transform_1(%arg0: i32) -> (i32, i32) {
    %c0_i32 = arith.constant 0 : i32
    %c0_i32_0 = arith.constant 0 : i32
    return %arg0, %c0_i32 : i32, i32
  }
}

</mosaic_0001>

<bundles_post_ra>
// kernel: tpu_custom_call.1
= control target key start
LH: loop header
LB: loop body
LE: loop exit
PB: predicated region body
PF: predicated region fallthrough
CT: control target
= control target key end

     0   :  { %6 = vsyncpa [#allocation3], 0  ;;  %s136_s0 = inlined_call_operand.hbm [shape: f32[8,256], index: 0, kind: input, shape index: {}]   ;;  %s137_s1 = inlined_call_operand.hbm [shape: f32[8,256], index: 1, kind: output, shape index: {}]  }
   0x1   :  { %7 = vsyncpa [#allocation4], 0  ;;  %s100_s6 = smov [#allocation2]   ;;  %s52_s10 = scalar_lea.hbm %s136_s0, 256 }
   0x2   :  { %s14_s7 = sshll.u32 %s100_s6, 4  ;;  %p53_p0 = scmp.ne.s32.totalorder %s136_s0, %s52_s10  ;;  %s15_s7 = int_to_ptr.vmem [resolvable:$true] %s14_s7 }
   0x3   :  { %p56_p1 = scmp.lt.u32.totalorder %s52_s10, %s136_s0 }
   0x5   :  { %p58_p2 = pnand %p56_p1, %p53_p0 }
   0x7   :  { %61 = shalt.err (!%p58_p2)
}
   0x8   :  { %s62_s15 = scalar_lea.vmem %s15_s7, 256  ;;  %p67_p4 = scmp.lt.s32.totalorder %s15_s7, %s15_s7 }
   0x9   :  { %p63_p3 = scmp.ne.s32.totalorder %s15_s7, %s62_s15  ;;  %p68_p5 = scmp.lt.s32.totalorder %s62_s15, %s62_s15 }
   0xb   :  { %p69_p6 = por %p68_p5, %p67_p4 }
   0xd   :  { %p70_p7 = pnand %p69_p6, %p63_p3 }
   0xf   :  { %73 = shalt.err (!%p70_p7)
}
  0x10   :  { %17 = dma.hbm_to_vmem [thread:$0]  %s136_s0, 256, %s15_s7, [#allocation3]  }
  0x11   :  { %96 = dma.done.wait [#allocation3], 256  }
  0x12   :  { %97 = vsyncadd [#allocation3], 4294967040  ;;  %v21_v0 = vld [vmem:[#allocation2] sm:$0xff]  ;;  %v22_v1 = vld [vmem:[#allocation2 + $0x8] sm:$0xff]  ;;  %s101_s18 = smov [#allocation5]  }
  0x13   :  { %v23_v2 = vsub.f32 %v22_v1, %v21_v0  ;;  %s37_s19 = sshll.u32 %s101_s18, 4  ;;  %s38_s19 = int_to_ptr.vmem [resolvable:$true] %s37_s19 }
  0x14   :  { %s74_s20 = scalar_lea.vmem %s38_s19, 256  ;;  %p79_p9 = scmp.lt.s32.totalorder %s38_s19, %s38_s19 }
  0x15   :  { %v24_v3 = vmul.f32 1.442695, %v23_v2  ;;  %p75_p8 = scmp.ne.s32.totalorder %s38_s19, %s74_s20  ;;  %p80_p10 = scmp.lt.s32.totalorder %s74_s20, %s74_s20 }
  0x17   :  { %48 = vpow2.f32 %v24_v3  ;;  %p81_p11 = por %p80_p10, %p79_p9 }
  0x19   :  { %p82_p12 = pnand %p81_p11, %p75_p8 }
  0x21   :  { %v49_v4 = vpop.eup %48 }
  0x22   :  { %v26_v5 = vadd.f32 1.0, %v49_v4 }
  0x24   :  { %50 = vrcp.f32 %v26_v5 }
  0x2e   :  { %v51_v6 = vpop.eup %50 }
  0x2f   :  { %29 = vst [vmem:[#allocation5] sm:$0xff] %v51_v6  ;;  %v28_v7 = vsub.f32 1.0, %v51_v6 }
  0x31   :  { %30 = vst [vmem:[#allocation5 + $0x8] sm:$0xff] %v28_v7 }
  0x32   :  { %85 = shalt.err (!%p82_p12)
}
  0x33   :  { %s86_s22 = scalar_lea.hbm %s137_s1, 256 }
  0x34   :  { %p87_p13 = scmp.ne.s32.totalorder %s137_s1, %s86_s22  ;;  %p90_p0 = scmp.lt.u32.totalorder %s86_s22, %s137_s1 }
  0x36   :  { %p92_p1 = pnand %p90_p0, %p87_p13 }
  0x38   :  { %95 = shalt.err (!%p92_p1)
}
  0x39   :  { %40 = dma.vmem_to_hbm [thread:$0]  %s38_s19, 256, %s137_s1, [#allocation4]  }
  0x3a   :  { %98 = dma.done.wait [#allocation4], 256  }
  0x3b   :  { %99 = vsyncadd [#allocation4], 4294967040 }
  0x3c   :  { %44 = vsyncpa [#allocation3], 1 }
  0x3d   :  { %45 = vsyncpa [#allocation4], 1 }

</bundles_post_ra>
